<compile_context>
chip_gen: v7x
topology: tpu7x:2x2x1
jax: 0.10.0
libtpu: 0.0.40
codegen_flags: <defaults>
</compile_context>

<pallas_src>
import math

import jax
import jax.numpy as jnp
from jax.experimental import pallas as pl
from jax.experimental.pallas import tpu as pltpu


def _round_up(x, m):
    return ((x + m - 1) // m) * m


def _make_link_predictor_kernel(num_linears):
    """Kernel factory: num_linears = total number of Linear layers in the MLP."""

    def kernel(*refs):
        xi_ref, xj_ref = refs[0], refs[1]
        o_ref = refs[-1]
        wb = refs[2:-1]                      # alternating (W, b) per layer

        # Edge feature: elementwise product on the VPU, in f32 (v5e has no bf16 VPU).
        h = xi_ref[...].astype(jnp.float32) * xj_ref[...].astype(jnp.float32)

        # Hidden layers: Linear -> ReLU.  Dropout = identity in eval mode.
        # bf16 MXU operands, f32 accumulation (single MXU pass per matmul instead
        # of the 3-6 passes f32 Precision.HIGHEST would cost).
        for layer in range(num_linears - 1):
            w = wb[2 * layer][...]           # (P*in, P*hid) bf16, block-diagonal
            b = wb[2 * layer + 1][...]       # (1, P*hid) f32
            h = jnp.dot(h.astype(jnp.bfloat16), w,
                        preferred_element_type=jnp.float32) + b
            h = jnp.maximum(h, 0.0)

        # Final (hidden -> out) layer: contract the packed feature dim directly
        # (A @ B^T form, no materialized transpose of h).  The result block is
        # (pack*out_ch, tile_rows) -> per-edge scalars sit on lanes, so bias add,
        # sigmoid and the store are lane-dense.
        w = wb[-2][...]                      # (P*out_ch, P*hid) bf16, block-diagonal
        b = wb[-1][...]                      # (P*out_ch, 1) f32
        y = jnp.einsum('ok,rk->or', w, h.astype(jnp.bfloat16),
                       preferred_element_type=jnp.float32) + b
        o_ref[...] = jax.nn.sigmoid(y).astype(o_ref.dtype)

    return kernel


def _prep_params(params, pack):
    """PyTorch-layout ((W[out,in], b[out]), ...) -> block-diagonal kernel params."""
    eye = jnp.eye(pack, dtype=jnp.float32)
    flat = []
    for w, b in params[:-1]:
        w = jnp.asarray(w, jnp.float32)
        b = jnp.asarray(b, jnp.float32)
        # kron(I_P, W.T) puts P copies of W.T on the diagonal: (P*in, P*out).
        flat.append(jnp.kron(eye, w.T).astype(jnp.bfloat16))
        flat.append(jnp.tile(b, pack).reshape(1, -1))          # (1, P*out) f32
    w, b = params[-1]
    w = jnp.asarray(w, jnp.float32)
    b = jnp.asarray(b, jnp.float32)
    flat.append(jnp.kron(eye, w).astype(jnp.bfloat16))         # (P*out_ch, P*hid)
    flat.append(jnp.tile(b, pack).reshape(-1, 1))              # (P*out_ch, 1) f32
    return flat


def link_predictor_forward(x_i, x_j, params, *, tile_n=8192):
    """Fused LinkPredictor forward.  params are PyTorch-layout (W[out,in], b[out])."""
    n, in_ch = x_i.shape
    hid_ch = params[0][0].shape[0]
    out_ch = params[-1][0].shape[0]
    num_linears = len(params)

    # Lane packing factor: process `pack` edges per vreg row so the narrow feature
    # dim fills the 128 lanes (pack=4 for 32-wide features).
    # TODO(synk): on v6e/v7x a pack of 2*128//feat (256-wide block-diag weights)
    # would also fill the 256-wide MXU stationary array.
    pack = max(1, 128 // max(in_ch, hid_ch))

    # Only pad N up to a multiple of `pack` (<= pack-1 rows); no padding to a tile
    # multiple -- the grid uses cdiv and Pallas handles the ragged last tile.
    n_pad = _round_up(n, pack)
    if n_pad != n:
        pad = ((0, n_pad - n), (0, 0))
        x_i = jnp.pad(x_i, pad)
        x_j = jnp.pad(x_j, pad)
    n_rows = n_pad // pack
    feat = pack * in_ch

    xi_pk = x_i.reshape(n_rows, feat)        # free row-major reshape
    xj_pk = x_j.reshape(n_rows, feat)

    # Packed rows per grid step: multiple of 128 so the lane-dense output block
    # satisfies the (8,128) rule; clamp for tiny inputs.  At the default
    # tile_n=8192 edges (tile_rows=2048) the f32 input double-buffers are ~4 MiB,
    # well inside the scoped VMEM on v5e/v6e/v7x.
    tile_rows = max(128, min(tile_n // pack, _round_up(n_rows, 128)))
    tile_rows = _round_up(tile_rows, 128)
    num_tiles = pl.cdiv(n_rows, tile_rows)

    flat_wb = _prep_params(params, pack)

    x_spec = pl.BlockSpec((tile_rows, feat), lambda i: (i, 0))
    wb_specs = [pl.BlockSpec(a.shape, lambda i: (0, 0)) for a in flat_wb]
    out_spec = pl.BlockSpec((pack * out_ch, tile_rows), lambda i: (0, i))

    out = pl.pallas_call(
        _make_link_predictor_kernel(num_linears),
        out_shape=jax.ShapeDtypeStruct((pack * out_ch, n_rows), jnp.float32),
        grid=(num_tiles,),
        in_specs=[x_spec, x_spec] + wb_specs,
        out_specs=out_spec,
        compiler_params=pltpu.CompilerParams(
            dimension_semantics=("parallel",),   # shard batch tiles across TCs
            vmem_limit_bytes=32 * 1024 * 1024,
        ),
    )(xi_pk, xj_pk, *flat_wb)

    # (pack*out_ch, n_rows) -> (N, out_channels); drop the <= pack-1 padded rows.
    out = out.reshape(pack, out_ch, n_rows).transpose(2, 0, 1).reshape(n_pad, out_ch)
    return out[:n]


def init_link_predictor(key, in_channels, hidden_channels, out_channels, num_layers):
    """PyTorch-layout init mimicking nn.Linear defaults (uniform +/- 1/sqrt(fan_in))."""
    dims = [in_channels] + [hidden_channels] * (num_layers - 1) + [out_channels]
    params = []
    for fan_in, fan_out in zip(dims[:-1], dims[1:]):
        key, kw, kb = jax.random.split(key, 3)
        bound = 1.0 / math.sqrt(fan_in)
        w = jax.random.uniform(kw, (fan_out, fan_in), jnp.float32, -bound, bound)
        b = jax.random.uniform(kb, (fan_out,), jnp.float32, -bound, bound)
        params.append((w, b))
    return tuple(params)


def reference_forward(x_i, x_j, params, *, mxu_dtype=None):
    """Pure-JAX reference.  mxu_dtype=bf16 mirrors the kernel's matmul numerics."""
    cast = (lambda a: a.astype(mxu_dtype)) if mxu_dtype is not None else (lambda a: a)
    x = x_i.astype(jnp.float32) * x_j.astype(jnp.float32)
    for w, b in params[:-1]:
        x = jnp.dot(cast(x), cast(w.T), preferred_element_type=jnp.float32) + b
        x = jnp.maximum(x, 0.0)               # dropout: eval mode => identity
    w, b = params[-1]
    x = jnp.dot(cast(x), cast(w.T), preferred_element_type=jnp.float32) + b
    return jax.nn.sigmoid(x)


if __name__ == "__main__":
    in_channels = 32
    hidden_channels = 32
    out_channels = 1
    num_layers = 3
    dropout = 0.5  # identity at inference

    key = jax.random.PRNGKey(0)
    k_params, k_xi, k_xj = jax.random.split(key, 3)
    params = init_link_predictor(k_params, in_channels, hidden_channels,
                                 out_channels, num_layers)

    # Test 1: tiny batch (single tile, ragged block).
    batch = 8
    x_i = jax.random.normal(k_xi, (batch, in_channels), jnp.float32)
    x_j = jax.random.normal(k_xj, (batch, in_channels), jnp.float32)
    out = jax.block_until_ready(link_predictor_forward(x_i, x_j, params))
    ref_exact = reference_forward(x_i, x_j, params)
    ref_bf16 = reference_forward(x_i, x_j, params, mxu_dtype=jnp.bfloat16)
    assert out.shape == (batch, out_channels)
    assert jnp.allclose(out, ref_bf16, atol=2e-3), float(jnp.max(jnp.abs(out - ref_bf16)))
    assert jnp.allclose(out, ref_exact, atol=5e-2), float(jnp.max(jnp.abs(out - ref_exact)))

    # Test 2: multi-tile grid + ragged last tile + pack padding (batch % 4 != 0).
    batch2 = 519
    k_xi2, k_xj2 = jax.random.split(k_xi)
    x_i2 = jax.random.normal(k_xi2, (batch2, in_channels), jnp.float32)
    x_j2 = jax.random.normal(k_xj2, (batch2, in_channels), jnp.float32)
    out2 = jax.block_until_ready(
        link_predictor_forward(x_i2, x_j2, params, tile_n=512))
    ref2_bf16 = reference_forward(x_i2, x_j2, params, mxu_dtype=jnp.bfloat16)
    ref2_exact = reference_forward(x_i2, x_j2, params)
    assert out2.shape == (batch2, out_channels)
    assert jnp.allclose(out2, ref2_bf16, atol=2e-3), float(jnp.max(jnp.abs(out2 - ref2_bf16)))
    assert jnp.allclose(out2, ref2_exact, atol=5e-2)

    print("KERNEL_OK")
</pallas_src>

<mosaic_0001>
module attributes {stable_mosaic.version = 11 : i64} {
  func.func @kernel(%arg0: i32, %arg1: memref<128x128xf32, #tpu.memory_space<vmem>>, %arg2: memref<128x128xf32, #tpu.memory_space<vmem>>, %arg3: memref<128x128xbf16, #tpu.memory_space<vmem>>, %arg4: memref<1x128xf32, #tpu.memory_space<vmem>>, %arg5: memref<128x128xbf16, #tpu.memory_space<vmem>>, %arg6: memref<1x128xf32, #tpu.memory_space<vmem>>, %arg7: memref<4x128xbf16, #tpu.memory_space<vmem>>, %arg8: memref<4x1xf32, #tpu.memory_space<vmem>>, %arg9: memref<4x128xf32, #tpu.memory_space<vmem>>) attributes {dimension_semantics = [#tpu.dimension_semantics<parallel>], iteration_bounds = array<i64: 1>, scalar_prefetch = 0 : i64, scratch_operands = 0 : i64, tpu.core_type = #tpu.core_type<tc>, window_params = [{transform_indices = @transform_0, window_bounds = array<i64: 128, 128>}, {transform_indices = @transform_1, window_bounds = array<i64: 128, 128>}, {pipeline_mode = #tpu.pipeline_mode<synchronous>, transform_indices = @transform_2, window_bounds = array<i64: 128, 128>}, {pipeline_mode = #tpu.pipeline_mode<synchronous>, transform_indices = @transform_3, window_bounds = array<i64: 1, 128>}, {pipeline_mode = #tpu.pipeline_mode<synchronous>, transform_indices = @transform_4, window_bounds = array<i64: 128, 128>}, {pipeline_mode = #tpu.pipeline_mode<synchronous>, transform_indices = @transform_5, window_bounds = array<i64: 1, 128>}, {pipeline_mode = #tpu.pipeline_mode<synchronous>, transform_indices = @transform_6, window_bounds = array<i64: 4, 128>}, {pipeline_mode = #tpu.pipeline_mode<synchronous>, transform_indices = @transform_7, window_bounds = array<i64: 4, 1>}, {transform_indices = @transform_8, window_bounds = array<i64: 4, 128>}]} {
    %c0 = arith.constant 0 : index
    %c0_0 = arith.constant 0 : index
    %0 = vector.load %arg1[%c0, %c0_0] : memref<128x128xf32, #tpu.memory_space<vmem>>, vector<128x128xf32>
    %c0_1 = arith.constant 0 : index
    %c0_2 = arith.constant 0 : index
    %1 = vector.load %arg2[%c0_1, %c0_2] : memref<128x128xf32, #tpu.memory_space<vmem>>, vector<128x128xf32>
    %2 = arith.mulf %0, %1 : vector<128x128xf32>
    %c0_3 = arith.constant 0 : index
    %c0_4 = arith.constant 0 : index
    %3 = vector.load %arg3[%c0_3, %c0_4] : memref<128x128xbf16, #tpu.memory_space<vmem>>, vector<128x128xbf16>
    %c0_5 = arith.constant 0 : index
    %c0_6 = arith.constant 0 : index
    %4 = vector.load %arg4[%c0_5, %c0_6] : memref<1x128xf32, #tpu.memory_space<vmem>>, vector<1x128xf32>
    %5 = arith.truncf %2 : vector<128x128xf32> to vector<128x128xbf16>
    %cst = arith.constant dense<0.000000e+00> : vector<128x128xf32>
    %6 = tpu.matmul %5, %3, %cst {dimension_numbers = #tpu.dot_dimension_numbers<[1], [0], [0], [1], [0, 0, 1, 1], [], []>} : vector<128x128xbf16>, vector<128x128xbf16>, vector<128x128xf32> -> vector<128x128xf32>
    %7 = vector.broadcast %4 : vector<1x128xf32> to vector<128x128xf32>
    %8 = arith.addf %6, %7 : vector<128x128xf32>
    %cst_7 = arith.constant 0.000000e+00 : f32
    %9 = vector.broadcast %cst_7 : f32 to vector<128x128xf32>
    %10 = arith.maximumf %8, %9 : vector<128x128xf32>
    %c0_8 = arith.constant 0 : index
    %c0_9 = arith.constant 0 : index
    %11 = vector.load %arg5[%c0_8, %c0_9] : memref<128x128xbf16, #tpu.memory_space<vmem>>, vector<128x128xbf16>
    %c0_10 = arith.constant 0 : index
    %c0_11 = arith.constant 0 : index
    %12 = vector.load %arg6[%c0_10, %c0_11] : memref<1x128xf32, #tpu.memory_space<vmem>>, vector<1x128xf32>
    %13 = arith.truncf %10 : vector<128x128xf32> to vector<128x128xbf16>
    %cst_12 = arith.constant dense<0.000000e+00> : vector<128x128xf32>
    %14 = tpu.matmul %13, %11, %cst_12 {dimension_numbers = #tpu.dot_dimension_numbers<[1], [0], [0], [1], [0, 0, 1, 1], [], []>} : vector<128x128xbf16>, vector<128x128xbf16>, vector<128x128xf32> -> vector<128x128xf32>
    %15 = vector.broadcast %12 : vector<1x128xf32> to vector<128x128xf32>
    %16 = arith.addf %14, %15 : vector<128x128xf32>
    %cst_13 = arith.constant 0.000000e+00 : f32
    %17 = vector.broadcast %cst_13 : f32 to vector<128x128xf32>
    %18 = arith.maximumf %16, %17 : vector<128x128xf32>
    %c0_14 = arith.constant 0 : index
    %c0_15 = arith.constant 0 : index
    %19 = vector.load %arg7[%c0_14, %c0_15] : memref<4x128xbf16, #tpu.memory_space<vmem>>, vector<4x128xbf16>
    %c0_16 = arith.constant 0 : index
    %c0_17 = arith.constant 0 : index
    %20 = vector.load %arg8[%c0_16, %c0_17] : memref<4x1xf32, #tpu.memory_space<vmem>>, vector<4x1xf32>
    %21 = arith.truncf %18 : vector<128x128xf32> to vector<128x128xbf16>
    "tpu.trace_start"() <{level = 10 : i32, message = "ok,rk->or"}> : () -> ()
    %cst_18 = arith.constant dense<0.000000e+00> : vector<4x128xf32>
    %22 = tpu.matmul %19, %21, %cst_18 {dimension_numbers = #tpu.dot_dimension_numbers<[1], [1], [0], [0], [0, 0, 1, 0], [], []>} : vector<4x128xbf16>, vector<128x128xbf16>, vector<4x128xf32> -> vector<4x128xf32>
    "tpu.trace_stop"() : () -> ()
    %23 = vector.broadcast %20 : vector<4x1xf32> to vector<4x128xf32>
    %24 = arith.addf %22, %23 : vector<4x128xf32>
    %25 = arith.negf %24 : vector<4x128xf32>
    %26 = math.exp %25 : vector<4x128xf32>
    %cst_19 = arith.constant 1.000000e+00 : f32
    %27 = vector.broadcast %cst_19 : f32 to vector<4x128xf32>
    %28 = arith.addf %27, %26 : vector<4x128xf32>
    %29 = arith.divf %27, %28 : vector<4x128xf32>
    %c0_20 = arith.constant 0 : index
    %c0_21 = arith.constant 0 : index
    %30 = vector.load %arg9[%c0_20, %c0_21] : memref<4x128xf32, #tpu.memory_space<vmem>>, vector<4x128xf32>
    tpu.vector_store %arg9[%c0_20, %c0_21], %29 {strides = array<i32>} : memref<4x128xf32, #tpu.memory_space<vmem>>, vector<4x128xf32>,
    return
  }
  func.func @transform_0(%arg0: i32) -> (i32, i32) {
    %c0_i32 = arith.constant 0 : i32
    %c0_i32_0 = arith.constant 0 : i32
    return %arg0, %c0_i32 : i32, i32
  }
  func.func @transform_1(%arg0: i32) -> (i32, i32) {
    %c0_i32 = arith.constant 0 : i32
    %c0_i32_0 = arith.constant 0 : i32
    return %arg0, %c0_i32 : i32, i32
  }
  func.func @transform_2(%arg0: i32) -> (i32, i32) {
    %c0_i32 = arith.constant 0 : i32
    %c0_i32_0 = arith.constant 0 : i32
    %c0_i32_1 = arith.constant 0 : i32
    return %c0_i32, %c0_i32_0 : i32, i32
  }
  func.func @transform_3(%arg0: i32) -> (i32, i32) {
    %c0_i32 = arith.constant 0 : i32
    %c0_i32_0 = arith.constant 0 : i32
    %c0_i32_1 = arith.constant 0 : i32
    return %c0_i32, %c0_i32_0 : i32, i32
  }
  func.func @transform_4(%arg0: i32) -> (i32, i32) {
    %c0_i32 = arith.constant 0 : i32
    %c0_i32_0 = arith.constant 0 : i32
    %c0_i32_1 = arith.constant 0 : i32
    return %c0_i32, %c0_i32_0 : i32, i32
  }
  func.func @transform_5(%arg0: i32) -> (i32, i32) {
    %c0_i32 = arith.constant 0 : i32
    %c0_i32_0 = arith.constant 0 : i32
    %c0_i32_1 = arith.constant 0 : i32
    return %c0_i32, %c0_i32_0 : i32, i32
  }
  func.func @transform_6(%arg0: i32) -> (i32, i32) {
    %c0_i32 = arith.constant 0 : i32
    %c0_i32_0 = arith.constant 0 : i32
    %c0_i32_1 = arith.constant 0 : i32
    return %c0_i32, %c0_i32_0 : i32, i32
  }
  func.func @transform_7(%arg0: i32) -> (i32, i32) {
    %c0_i32 = arith.constant 0 : i32
    %c0_i32_0 = arith.constant 0 : i32
    %c0_i32_1 = arith.constant 0 : i32
    return %c0_i32, %c0_i32_0 : i32, i32
  }
  func.func @transform_8(%arg0: i32) -> (i32, i32) {
    %c0_i32 = arith.constant 0 : i32
    %c0_i32_0 = arith.constant 0 : i32
    return %c0_i32, %arg0 : i32, i32
  }
}

</mosaic_0001>

<bundles_post_ra>
// kernel: tpu_custom_call.1
= control target key start
LH: loop header
LB: loop body
LE: loop exit
PB: predicated region body
PF: predicated region fallthrough
CT: control target
= control target key end

     0   :  { %13 = vsyncpa [#allocation3], 0  ;;  %s974_s0 = inlined_call_operand.vmem [shape: f32[2,128], index: 0, kind: input, shape index: {}]   ;;  %s975_s1 = inlined_call_operand.vmem [shape: f32[2,128], index: 1, kind: input, shape index: {}]   ;;  %s976_s2 = inlined_call_operand.hbm [shape: bf16[128,128], index: 2, kind: input, shape index: {}]   ;;  %s977_s3 = inlined_call_operand.vmem [shape: f32[1,128], index: 3, kind: input, shape index: {}]   ;;  %s978_s4 = inlined_call_operand.hbm [shape: bf16[128,128], index: 4, kind: input, shape index: {}]   ;;  %s979_s5 = inlined_call_operand.vmem [shape: f32[1,128], index: 5, kind: input, shape index: {}]   ;;  %s980_s6 = inlined_call_operand.vmem [shape: bf16[4,128], index: 6, kind: input, shape index: {}]   ;;  %s981_s7 = inlined_call_operand.vmem [shape: f32[4,1], index: 7, kind: input, shape index: {}]   ;;  %s982_s8 = inlined_call_operand.vmem [shape: f32[4,2], index: 8, kind: output, shape index: {}]  }
   0x1   :  { %14 = vsyncpa [#allocation5], 0  ;;  %s778_s27 = smov [#allocation2]   ;;  %s730_s9 = scalar_lea.hbm %s976_s2, 1024 }
   0x2   :  { %s24_s28 = sshll.u32 %s778_s27, 4  ;;  %p731_p0 = scmp.ne.s32.totalorder %s976_s2, %s730_s9  ;;  %s25_s28 = int_to_ptr.vmem [resolvable:$true] %s24_s28 }
   0x3   :  { %p734_p1 = scmp.lt.u32.totalorder %s730_s9, %s976_s2 }
   0x5   :  { %p736_p2 = pnand %p734_p1, %p731_p0 }
   0x7   :  { %739 = shalt.err (!%p736_p2)
}
   0x8   :  { %s740_s14 = scalar_lea.vmem %s25_s28, 1024  ;;  %p745_p4 = scmp.lt.s32.totalorder %s25_s28, %s25_s28 }
   0x9   :  { %p741_p3 = scmp.ne.s32.totalorder %s25_s28, %s740_s14  ;;  %p746_p5 = scmp.lt.s32.totalorder %s740_s14, %s740_s14 }
   0xb   :  { %p747_p6 = por %p746_p5, %p745_p4 }
   0xd   :  { %p748_p7 = pnand %p747_p6, %p741_p3 }
   0xf   :  { %751 = shalt.err (!%p748_p7)
}
  0x10   :  { %s779_s15 = smov 64   ;;  %s780_s16 = smov 4  }
  0x11   :  { %30 = dma.hbm_to_vmem [thread:$0]  %s976_s2, 1024, %s25_s28, [#allocation3], %s779_s15, %s779_s15, %s780_s16  }
  0x12   :  { %s781_s19 = smov [#allocation4]   ;;  %s752_s23 = scalar_lea.hbm %s978_s4, 1024 }
  0x13   :  { %s38_s20 = sshll.u32 %s781_s19, 4  ;;  %p753_p8 = scmp.ne.s32.totalorder %s978_s4, %s752_s23  ;;  %s39_s20 = int_to_ptr.vmem [resolvable:$true] %s38_s20 }
  0x14   :  { %p756_p9 = scmp.lt.u32.totalorder %s752_s23, %s978_s4 }
  0x16   :  { %p758_p10 = pnand %p756_p9, %p753_p8 }
  0x18   :  { %761 = shalt.err (!%p758_p10)
}
  0x19   :  { %s762_s29 = scalar_lea.vmem %s39_s20, 1024  ;;  %p767_p12 = scmp.lt.s32.totalorder %s39_s20, %s39_s20 }
  0x1a   :  { %p763_p11 = scmp.ne.s32.totalorder %s39_s20, %s762_s29  ;;  %p768_p13 = scmp.lt.s32.totalorder %s762_s29, %s762_s29 }
  0x1c   :  { %p769_p0 = por %p768_p13, %p767_p12 }
  0x1e   :  { %p770_p1 = pnand %p769_p0, %p763_p11 }
  0x20   :  { %773 = shalt.err (!%p770_p1)
}
  0x21   :  { %44 = dma.hbm_to_vmem [thread:$0]  %s978_s4, 1024, %s39_s20, [#allocation5], %s779_s15, %s779_s15, %s780_s16  }
  0x22   :  { %774 = dma.done.wait [#allocation3], 1024  }
  0x23   :  { %775 = vsyncadd [#allocation3], 4294966272 }
  0x24   :  { %776 = dma.done.wait [#allocation5], 1024  }
  0x25   :  { %777 = vsyncadd [#allocation5], 4294966272  ;;  %v710_v0 = vld [vmem:[#allocation2] sm:$0xff]   ;;  %v711_v1 = vld [vmem:[#allocation2 + $0x8] sm:$0xff]   ;;  %vm783_vm0 = vmmov 0  }
  0x26   :  { %618 = vmatprep.subr.bf16.mxu1 %v710_v0  ;;  %v712_v2 = vld [vmem:[#allocation2 + $0x10] sm:$0xff]   ;;  %v713_v3 = vld [vmem:[#allocation2 + $0x18] sm:$0xff]   ;;  %v58_v4 = vld [vmem:[%s974_s0] sm:$0xff] }
  0x27   :  { %619 = vmatpush3.bf16.msra.mxu1 %v710_v0  ;;  %v59_v5 = vld [vmem:[%s974_s0 + $0x8] sm:$0xff]  ;;  %v74_v6 = vld [vmem:[%s975_s1] sm:$0xff]  ;;  %v716_v13 = vld [vmem:[#allocation2 + $0x30] sm:$0xff]  }
  0x28   :  { %620 = vmatprep.subr.bf16.mxu1 %v711_v1  ;;  %v75_v7 = vld [vmem:[%s975_s1 + $0x8] sm:$0xff]  ;;  %v90_v8 = vmul.f32 %v74_v6, %v58_v4  ;;  %v714_v10 = vld [vmem:[#allocation2 + $0x20] sm:$0xff]   ;;  %v60_v14 = vld [vmem:[%s974_s0 + $0x10] sm:$0xff] }
  0x29   :  { %v91_v9 = vmul.f32 %v75_v7, %v59_v5  ;;  %v715_v12 = vld [vmem:[#allocation2 + $0x28] sm:$0xff]   ;;  %v61_v15 = vld [vmem:[%s974_s0 + $0x18] sm:$0xff]  ;;  %v76_v16 = vld [vmem:[%s975_s1 + $0x10] sm:$0xff] }
  0x2a   :  { %v77_v17 = vld [vmem:[%s975_s1 + $0x18] sm:$0xff]  ;;  %v62_v19 = vld [vmem:[%s974_s0 + $0x20] sm:$0xff]  ;;  %v63_v20 = vld [vmem:[%s974_s0 + $0x28] sm:$0xff]  ;;  %v92_v23 = vmul.f32 %v76_v16, %v60_v14 }
  0x2b   :  { %621 = vmatpush3.bf16.msra.mxu1 %v711_v1  ;;  %v123_v11 = vpack.c.bf16 %v91_v9, %v90_v8  ;;  %v717_v18 = vld [vmem:[#allocation2 + $0x38] sm:$0xff]   ;;  %v78_v21 = vld [vmem:[%s975_s1 + $0x20] sm:$0xff]  ;;  %v79_v22 = vld [vmem:[%s975_s1 + $0x28] sm:$0xff]  ;;  %v93_v24 = vmul.f32 %v77_v17, %v61_v15 }
  0x2c   :  { %622 = vmatprep.subr.bf16.mxu1 %v712_v2  ;;  %v94_v25 = vmul.f32 %v78_v21, %v62_v19  ;;  %v95_v26 = vmul.f32 %v79_v22, %v63_v20  ;;  %v718_v27 = vld [vmem:[#allocation4] sm:$0xff]   ;;  %v64_v29 = vld [vmem:[%s974_s0 + $0x30] sm:$0xff]  ;;  %v65_v30 = vld [vmem:[%s974_s0 + $0x38] sm:$0xff] }
  0x2d   :  { %634 = vmatprep.mubr.bf16.mxu1 %v123_v11  ;;  %v124_v28 = vpack.c.bf16 %v93_v24, %v92_v23  ;;  %v80_v31 = vld [vmem:[%s975_s1 + $0x30] sm:$0xff]  ;;  %v81_v33 = vld [vmem:[%s975_s1 + $0x38] sm:$0xff]  ;;  %v66_v34 = vld [vmem:[%s974_s0 + $0x40] sm:$0xff] }
  0x2e   :  { %v125_v32 = vpack.c.bf16 %v95_v26, %v94_v25  ;;  %v67_v35 = vld [vmem:[%s974_s0 + $0x48] sm:$0xff]  ;;  %v82_v36 = vld [vmem:[%s975_s1 + $0x40] sm:$0xff]  ;;  %v96_v39 = vmul.f32 %v80_v31, %v64_v29  ;;  %v97_v40 = vmul.f32 %v81_v33, %v65_v30  ;;  %v720_v43 = vld [vmem:[#allocation4 + $0x10] sm:$0xff]  }
  0x2f   :  { %623 = vmatpush3.bf16.msra.mxu1 %v712_v2  ;;  %v83_v37 = vld [vmem:[%s975_s1 + $0x48] sm:$0xff]  ;;  %v98_v41 = vmul.f32 %v82_v36, %v66_v34  ;;  %v68_v45 = vld [vmem:[%s974_s0 + $0x50] sm:$0xff]  ;;  %v69_v46 = vld [vmem:[%s974_s0 + $0x58] sm:$0xff] }
  0x30   :  { %624 = vmatprep.subr.bf16.mxu1 %v713_v3  ;;  %v719_v38 = vld [vmem:[#allocation4 + $0x8] sm:$0xff]   ;;  %v99_v42 = vmul.f32 %v83_v37, %v67_v35  ;;  %v126_v44 = vpack.c.bf16 %v97_v40, %v96_v39  ;;  %v84_v47 = vld [vmem:[%s975_s1 + $0x50] sm:$0xff]  ;;  %v85_v49 = vld [vmem:[%s975_s1 + $0x58] sm:$0xff] }
  0x31   :  { %v70_v50 = vld [vmem:[%s974_s0 + $0x60] sm:$0xff]  ;;  %v71_v51 = vld [vmem:[%s974_s0 + $0x68] sm:$0xff]  ;;  %v721_v54 = vld [vmem:[#allocation4 + $0x18] sm:$0xff]   ;;  %v100_v55 = vmul.f32 %v84_v47, %v68_v45  ;;  %v101_v56 = vmul.f32 %v85_v49, %v69_v46 }
  0x32   :  { %v127_v48 = vpack.c.bf16 %v99_v42, %v98_v41  ;;  %v86_v52 = vld [vmem:[%s975_s1 + $0x60] sm:$0xff]  ;;  %v87_v53 = vld [vmem:[%s975_s1 + $0x68] sm:$0xff]  ;;  %v72_v61 = vld [vmem:[%s974_s0 + $0x70] sm:$0xff] }
  0x33   :  { %625 = vmatpush3.bf16.msra.mxu1 %v713_v3  ;;  %v102_v57 = vmul.f32 %v86_v52, %v70_v50  ;;  %v103_v58 = vmul.f32 %v87_v53, %v71_v51  ;;  %v722_v59 = vld [vmem:[#allocation4 + $0x20] sm:$0xff]   ;;  %v128_v60 = vpack.c.bf16 %v101_v56, %v100_v55  ;;  %v73_v63 = vld [vmem:[%s974_s0 + $0x78] sm:$0xff]  ;;  %v88_v0 = vld [vmem:[%s975_s1 + $0x70] sm:$0xff] }
  0x34   :  { %626 = vmatprep.subr.bf16.mxu1 %v714_v10  ;;  %v89_v1 = vld [vmem:[%s975_s1 + $0x78] sm:$0xff]  ;;  %v723_v2 = vld [vmem:[#allocation4 + $0x28] sm:$0xff]   ;;  %v104_v3 = vmul.f32 %v88_v0, %v72_v61  ;;  %v724_v6 = vld [vmem:[#allocation4 + $0x30] sm:$0xff]  }
  0x35   :  { %v129_v62 = vpack.c.bf16 %v103_v58, %v102_v57  ;;  %v105_v4 = vmul.f32 %v89_v1, %v73_v63  ;;  %v725_v7 = vld [vmem:[#allocation4 + $0x38] sm:$0xff]   ;;  %v558_v8 = vld [vmem:[%s977_s3] ss:$0 sm:$0xff]  ;;  %v782_v1 = vmov 0.0  }
  0x36   :  { %682 = vmatprep.subr.bf16.mxu0 %v782_v1  ;;  %698 = vmatprep.mubr.msk.bf16.mxu0 %vm783_vm0, %v782_v1 }
  0x37   :  { %627 = vmatpush3.bf16.msra.mxu1 %v714_v10  ;;  %v130_v5 = vpack.c.bf16 %v105_v4, %v104_v3  ;;  %v784_v3 = vmov 0   ;;  %v567_v4 = vld [vmem:[%s979_s5] ss:$0 sm:$0xff] }
  0x38   :  { %628 = vmatprep.subr.bf16.mxu1 %v715_v12  ;;  %709 = vset.pattern.permute.xlu0 %v784_v3 }
  0x3b   :  { %629 = vmatpush3.bf16.msra.mxu1 %v715_v12 }
  0x3c   :  { %630 = vmatprep.subr.bf16.mxu1 %v716_v13 }
  0x3f   :  { %631 = vmatpush3.bf16.msra.mxu1 %v716_v13 }
  0x40   :  { %632 = vmatprep.subr.bf16.mxu1 %v717_v18 }
  0x43   :  { %633 = vmatpush3.bf16.msra.mxu1 %v717_v18 }
  0x44   :  { %650 = vmatprep.subr.bf16.mxu1 %v718_v27 }
  0x46   :  { %635 = vmatmul.mubr.bf16.vlgmr.msra.gmra.mrb[0].mxu1 %v124_v28 }
  0x47   :  { %638 = vmatprep.mubr.bf16.mxu1 %v125_v32  ;;  %651 = vmatpush3.bf16.msra.mxu1 %v718_v27 }
  0x48   :  { %652 = vmatprep.subr.bf16.mxu1 %v719_v38 }
  0x4b   :  { %653 = vmatpush3.bf16.msra.mxu1 %v719_v38 }
  0x4c   :  { %654 = vmatprep.subr.bf16.mxu1 %v720_v43 }
  0x4e   :  { %639 = vmatmul.mubr.bf16.gmra.mrb[4].mxu1 %v126_v44 }
  0x4f   :  { %642 = vmatprep.mubr.bf16.mxu1 %v127_v48  ;;  %655 = vmatpush3.bf16.msra.mxu1 %v720_v43 }
  0x50   :  { %656 = vmatprep.subr.bf16.mxu1 %v721_v54 }
  0x53   :  { %657 = vmatpush3.bf16.msra.mxu1 %v721_v54 }
  0x54   :  { %658 = vmatprep.subr.bf16.mxu1 %v722_v59 }
  0x56   :  { %643 = vmatmul.mubr.bf16.gmra.mrb[8].mxu1 %v128_v60 }
  0x57   :  { %646 = vmatprep.mubr.bf16.mxu1 %v129_v62  ;;  %659 = vmatpush3.bf16.msra.mxu1 %v722_v59 }
  0x58   :  { %660 = vmatprep.subr.bf16.mxu1 %v723_v2 }
  0x5b   :  { %661 = vmatpush3.bf16.msra.mxu1 %v723_v2  ;;  %v491_v2 = vld [vmem:[%s981_s7] sm:$0xf] }
  0x5c   :  { %662 = vmatprep.subr.bf16.mxu1 %v724_v6  ;;  %502 = vperm.xlu0 %709, %v491_v2  }
  0x5e   :  { %647 = vmatmul.mubr.bf16.gmra.mrb[12].mxu1 %v130_v5 }
  0x5f   :  { %663 = vmatpush3.bf16.msra.mxu1 %v724_v6 }
  0x60   :  { %664 = vmatprep.subr.bf16.mxu1 %v725_v7 }
  0x63   :  { %665 = vmatpush3.bf16.msra.mxu1 %v725_v7 }
 0x119   :  { %v636_v9 = vpop.f32.mrb[0].mxu1 }
 0x11a   :  { %v228_v10 = vadd.f32 %v636_v9, %v558_v8  ;;  %v219_v11 = vpop.f32.mrb[1].mxu1 }
 0x11b   :  { %v220_v12 = vadd.f32 %v558_v8, %v219_v11  ;;  %v637_v13 = vpop.f32.mrb[2].mxu1 }
 0x11c   :  { %v231_v14 = vadd.f32 %v637_v13, %v558_v8  ;;  %v222_v15 = vpop.f32.mrb[3].mxu1  ;;  %v284_v17 = vmax.f32 %v228_v10, 0.0 }
 0x11d   :  { %v223_v16 = vadd.f32 %v558_v8, %v222_v15  ;;  %v282_v19 = vmax.f32 %v220_v12, 0.0 }
 0x11e   :  { %v285_v18 = vmax.f32 %v231_v14, 0.0 }
 0x11f   :  { %v283_v20 = vmax.f32 %v223_v16, 0.0 }
 0x120   :  { %v316_v21 = vpack.c.bf16 %v285_v18, %v284_v17 }
 0x121   :  { %v315_v22 = vpack.c.bf16 %v283_v20, %v282_v19  ;;  %v640_v23 = vpop.f32.mrb[4].mxu1 }
 0x122   :  { %v244_v24 = vadd.f32 %v640_v23, %v558_v8  ;;  %v235_v25 = vpop.f32.mrb[5].mxu1 }
 0x123   :  { %v236_v26 = vadd.f32 %v558_v8, %v235_v25  ;;  %666 = vmatprep.mubr.bf16.mxu1 %v315_v22  ;;  %v641_v27 = vpop.f32.mrb[6].mxu1 }
 0x124   :  { %v288_v28 = vmax.f32 %v244_v24, 0.0  ;;  %v247_v29 = vadd.f32 %v641_v27, %v558_v8  ;;  %667 = vmatmul.mubr.bf16.vlgmr.msra.gmra.mrb[16].mxu1 %v316_v21  ;;  %v238_v30 = vpop.f32.mrb[7].mxu1 }
 0x125   :  { %v286_v31 = vmax.f32 %v236_v26, 0.0  ;;  %v239_v32 = vadd.f32 %v558_v8, %v238_v30 }
 0x126   :  { %v289_v33 = vmax.f32 %v247_v29, 0.0 }
 0x127   :  { %v287_v34 = vmax.f32 %v239_v32, 0.0 }
 0x128   :  { %v318_v35 = vpack.c.bf16 %v289_v33, %v288_v28 }
 0x129   :  { %v317_v36 = vpack.c.bf16 %v287_v34, %v286_v31  ;;  %v644_v37 = vpop.f32.mrb[8].mxu1 }
 0x12a   :  { %v260_v38 = vadd.f32 %v644_v37, %v558_v8  ;;  %v251_v39 = vpop.f32.mrb[9].mxu1 }
 0x12b   :  { %670 = vmatprep.mubr.bf16.mxu1 %v317_v36  ;;  %v252_v40 = vadd.f32 %v558_v8, %v251_v39  ;;  %v645_v41 = vpop.f32.mrb[10].mxu1 }
 0x12c   :  { %671 = vmatmul.mubr.bf16.gmra.mrb[20].mxu1 %v318_v35  ;;  %v292_v42 = vmax.f32 %v260_v38, 0.0  ;;  %v263_v43 = vadd.f32 %v645_v41, %v558_v8  ;;  %v254_v44 = vpop.f32.mrb[11].mxu1 }
 0x12d   :  { %v290_v45 = vmax.f32 %v252_v40, 0.0  ;;  %v255_v46 = vadd.f32 %v558_v8, %v254_v44 }
 0x12e   :  { %v293_v47 = vmax.f32 %v263_v43, 0.0 }
 0x12f   :  { %v291_v48 = vmax.f32 %v255_v46, 0.0 }
 0x130   :  { %v320_v49 = vpack.c.bf16 %v293_v47, %v292_v42 }
 0x131   :  { %v319_v50 = vpack.c.bf16 %v291_v48, %v290_v45  ;;  %v648_v51 = vpop.f32.mrb[12].mxu1 }
 0x132   :  { %v276_v52 = vadd.f32 %v648_v51, %v558_v8  ;;  %v267_v53 = vpop.f32.mrb[13].mxu1 }
 0x133   :  { %674 = vmatprep.mubr.bf16.mxu1 %v319_v50  ;;  %v268_v54 = vadd.f32 %v558_v8, %v267_v53  ;;  %v649_v55 = vpop.f32.mrb[14].mxu1 }
 0x134   :  { %675 = vmatmul.mubr.bf16.gmra.mrb[24].mxu1 %v320_v49  ;;  %v296_v56 = vmax.f32 %v276_v52, 0.0  ;;  %v279_v57 = vadd.f32 %v649_v55, %v558_v8  ;;  %v270_v58 = vpop.f32.mrb[15].mxu1 }
 0x135   :  { %v294_v59 = vmax.f32 %v268_v54, 0.0  ;;  %v271_v60 = vadd.f32 %v558_v8, %v270_v58 }
 0x136   :  { %v297_v61 = vmax.f32 %v279_v57, 0.0 }
 0x137   :  { %v295_v62 = vmax.f32 %v271_v60, 0.0 }
 0x138   :  { %v322_v63 = vpack.c.bf16 %v297_v61, %v296_v56  ;;  %v490_v61 = vld [vmem:[%s980_s6] sm:$0x3] }
 0x139   :  { %v321_v0 = vpack.c.bf16 %v295_v62, %v294_v59  ;;  %v503_v62 = vpop.permute.xlu0 %502 }
 0x13b   :  { %678 = vmatprep.mubr.bf16.mxu1 %v321_v0 }
 0x13c   :  { %679 = vmatmul.mubr.bf16.gmra.mrb[28].mxu1 %v322_v63 }
 0x1f7   :  { %v668_v5 = vpop.f32.mrb[16].mxu1 }
 0x1f8   :  { %v420_v6 = vadd.f32 %v668_v5, %v567_v4  ;;  %v411_v7 = vpop.f32.mrb[17].mxu1 }
 0x1f9   :  { %v412_v8 = vadd.f32 %v567_v4, %v411_v7  ;;  %v669_v9 = vpop.f32.mrb[18].mxu1 }
 0x1fa   :  { %v423_v10 = vadd.f32 %v669_v9, %v567_v4  ;;  %v414_v11 = vpop.f32.mrb[19].mxu1  ;;  %v476_v13 = vmax.f32 %v420_v6, 0.0 }
 0x1fb   :  { %v415_v12 = vadd.f32 %v567_v4, %v414_v11  ;;  %v474_v15 = vmax.f32 %v412_v8, 0.0 }
 0x1fc   :  { %v477_v14 = vmax.f32 %v423_v10, 0.0 }
 0x1fd   :  { %v475_v16 = vmax.f32 %v415_v12, 0.0 }
 0x1fe   :  { %v493_v17 = vpack.c.bf16 %v477_v14, %v476_v13 }
 0x1ff   :  { %v672_v18 = vpop.f32.mrb[20].mxu1  ;;  %v492_v19 = vpack.c.bf16 %v475_v16, %v474_v15 }
 0x200   :  { %v436_v20 = vadd.f32 %v672_v18, %v567_v4  ;;  %v427_v21 = vpop.f32.mrb[21].mxu1 }
 0x201   :  { %v428_v22 = vadd.f32 %v567_v4, %v427_v21  ;;  %683 = vmatpush3.bf16.xpose.msra.mxu0 %v492_v19  ;;  %v673_v23 = vpop.f32.mrb[22].mxu1 }
 0x202   :  { %v480_v24 = vmax.f32 %v436_v20, 0.0  ;;  %v439_v25 = vadd.f32 %v673_v23, %v567_v4  ;;  %v430_v26 = vpop.f32.mrb[23].mxu1  ;;  %684 = vmatprep.subr.bf16.mxu0 %v782_v1 }
 0x203   :  { %v478_v27 = vmax.f32 %v428_v22, 0.0  ;;  %v431_v28 = vadd.f32 %v567_v4, %v430_v26 }
 0x204   :  { %v481_v29 = vmax.f32 %v439_v25, 0.0 }
 0x205   :  { %v479_v30 = vmax.f32 %v431_v28, 0.0 }
 0x206   :  { %v495_v31 = vpack.c.bf16 %v481_v29, %v480_v24 }
 0x207   :  { %v494_v32 = vpack.c.bf16 %v479_v30, %v478_v27  ;;  %v676_v33 = vpop.f32.mrb[24].mxu1 }
 0x208   :  { %v452_v34 = vadd.f32 %v676_v33, %v567_v4  ;;  %v443_v35 = vpop.f32.mrb[25].mxu1 }
 0x209   :  { %685 = vmatpush3.bf16.xpose.msra.mxu0 %v493_v17  ;;  %v444_v36 = vadd.f32 %v567_v4, %v443_v35  ;;  %v677_v37 = vpop.f32.mrb[26].mxu1 }
 0x20a   :  { %v484_v38 = vmax.f32 %v452_v34, 0.0  ;;  %686 = vmatprep.subr.bf16.mxu0 %v782_v1  ;;  %v455_v39 = vadd.f32 %v677_v37, %v567_v4  ;;  %v446_v40 = vpop.f32.mrb[27].mxu1 }
 0x20b   :  { %v482_v41 = vmax.f32 %v444_v36, 0.0  ;;  %v447_v42 = vadd.f32 %v567_v4, %v446_v40 }
 0x20c   :  { %v485_v43 = vmax.f32 %v455_v39, 0.0 }
 0x20d   :  { %v483_v44 = vmax.f32 %v447_v42, 0.0 }
 0x20e   :  { %v497_v45 = vpack.c.bf16 %v485_v43, %v484_v38 }
 0x20f   :  { %v496_v46 = vpack.c.bf16 %v483_v44, %v482_v41  ;;  %v680_v47 = vpop.f32.mrb[28].mxu1 }
 0x210   :  { %v468_v48 = vadd.f32 %v680_v47, %v567_v4  ;;  %v459_v49 = vpop.f32.mrb[29].mxu1 }
 0x211   :  { %687 = vmatpush3.bf16.xpose.msra.mxu0 %v494_v32  ;;  %v460_v50 = vadd.f32 %v567_v4, %v459_v49  ;;  %v681_v51 = vpop.f32.mrb[30].mxu1 }
 0x212   :  { %688 = vmatprep.subr.bf16.mxu0 %v782_v1  ;;  %v488_v52 = vmax.f32 %v468_v48, 0.0  ;;  %v471_v53 = vadd.f32 %v681_v51, %v567_v4  ;;  %v462_v54 = vpop.f32.mrb[31].mxu1 }
 0x213   :  { %v486_v55 = vmax.f32 %v460_v50, 0.0  ;;  %v463_v56 = vadd.f32 %v567_v4, %v462_v54 }
 0x214   :  { %v489_v57 = vmax.f32 %v471_v53, 0.0 }
 0x215   :  { %v487_v58 = vmax.f32 %v463_v56, 0.0 }
 0x216   :  { %v499_v59 = vpack.c.bf16 %v489_v57, %v488_v52 }
 0x217   :  { %v498_v60 = vpack.c.bf16 %v487_v58, %v486_v55 }
 0x219   :  { %689 = vmatpush3.bf16.xpose.msra.mxu0 %v495_v31 }
 0x21a   :  { %690 = vmatprep.subr.bf16.mxu0 %v782_v1 }
 0x221   :  { %691 = vmatpush3.bf16.xpose.msra.mxu0 %v496_v46 }
 0x222   :  { %692 = vmatprep.subr.bf16.mxu0 %v782_v1 }
 0x229   :  { %693 = vmatpush3.bf16.xpose.msra.mxu0 %v497_v45 }
 0x22a   :  { %694 = vmatprep.subr.bf16.mxu0 %v782_v1 }
 0x231   :  { %695 = vmatpush3.bf16.xpose.msra.mxu0 %v498_v60 }
 0x232   :  { %696 = vmatprep.subr.bf16.mxu0 %v782_v1 }
 0x239   :  { %697 = vmatpush3.bf16.xpose.msra.mxu0 %v499_v59 }
 0x240   :  { %699 = vmatmul.mubr.bf16.vlgmr.msra.gmra.mrb[0].mxu0 %v490_v61 }
 0x313   :  { %v539_v63 = vpop.f32.mrb[0].mxu0 }
 0x314   :  { %v540_v0 = vadd.f32 %v539_v63, %v503_v62  ;;  %v700_v2 = vpop.f32.mrb[1].mxu0 }
 0x315   :  { %v542_v3 = vpop.f32.mrb[2].mxu0 }
 0x316   :  { %v576_v4 = vmul.f32 -1.442695, %v540_v0  ;;  %v701_v5 = vpop.f32.mrb[3].mxu0 }
 0x318   :  { %726 = vpow2.f32 %v576_v4 }
 0x322   :  { %v727_v6 = vpop.eup %726 }
 0x323   :  { %v548_v7 = vadd.f32 1.0, %v727_v6 }
 0x325   :  { %728 = vrcp.f32 %v548_v7 }
 0x32f   :  { %v729_v8 = vpop.eup %728 }
 0x330   :  { %551 = vst [vmem:[%s982_s8] sm:$0xf] %v729_v8 }
 0x331   :  { %556 = vsyncpa [#allocation3], 1 }
 0x332   :  { %557 = vsyncpa [#allocation5], 1 }

</bundles_post_ra>
